<compile_context>
chip_gen: v7x
topology: tpu7x:2x2x1
jax: 0.10.0
libtpu: 0.0.40
codegen_flags: <defaults>
</compile_context>

<pallas_src>
import jax
import jax.numpy as jnp
from jax.experimental import pallas as pl
from jax.experimental.pallas import tpu as pltpu

D = 5     # input features (as in the PyTorch module)
H = 64    # hidden width
K = 3     # output classes


def _round_up(n, m):
    return ((n + m - 1) // m) * m


def _choose_tb(B, max_tb=4096):
    """Batch tile: multiple of 8, ~4 grid steps for large B, capped at max_tb."""
    if B <= 8:
        return 8
    tb = _round_up(pl.cdiv(B, 4), 8)   # aim for a small (~4-step) grid
    return max(8, min(tb, max_tb))


def _mlp_kernel(x_ref, w1_ref, b1_ref, w2_ref, b2_ref, o_ref):
    # fc1: (TB, D) @ (D, H) on the MXU, f32 accumulate; bias + ReLU in f32 on the VPU.
    h = jnp.dot(x_ref[...], w1_ref[...], preferred_element_type=jnp.float32)
    h = jnp.maximum(h + b1_ref[...], 0.0)
    # fc2: (TB, H) @ (H, K) f32 accumulate; bias add; store un-padded (TB, K) block.
    out = jnp.dot(h, w2_ref[...], preferred_element_type=jnp.float32)
    o_ref[...] = (out + b2_ref[...]).astype(o_ref.dtype)


def prepare_params(w1, b1, w2, b2):
    """One-time parameter prep (layout/dtype). Call once, reuse for every forward.

    Expects w1: (D, H), b1: (H,) or (1, H), w2: (H, K), b2: (K,) or (1, K)
    (i.e. weights already transposed vs. PyTorch's (out, in) layout).
    """
    return (
        jnp.asarray(w1, jnp.float32).reshape(D, H),
        jnp.asarray(b1, jnp.float32).reshape(1, H),
        jnp.asarray(w2, jnp.float32).reshape(H, K),
        jnp.asarray(b2, jnp.float32).reshape(1, K),
    )


def simple_net_forward(x, w1, b1, w2, b2, *, max_block_b=4096):
    """Fused SimpleNet forward.

    x:  (B, D) float32
    w1: (D, H), b1: (1, H), w2: (H, K), b2: (1, K)  -- from prepare_params().
    Returns (B, K) float32.
    """
    B = x.shape[0]
    TB = _choose_tb(B, max_block_b)
    Bp = _round_up(B, TB)

    # Only the batch dim is ever padded (and only when B is not a TB multiple), so
    # garbage rows never reach user-visible memory: they are sliced off below.
    x_in = x if Bp == B else jnp.pad(x, ((0, Bp - B), (0, 0)))

    grid = (Bp // TB,)

    out = pl.pallas_call(
        _mlp_kernel,
        out_shape=jax.ShapeDtypeStruct((Bp, K), jnp.float32),
        grid=grid,
        in_specs=[
            pl.BlockSpec((TB, D), lambda i: (i, 0)),   # x tiles stream over batch
            pl.BlockSpec((D, H), lambda i: (0, 0)),    # weights/biases stay VMEM-resident
            pl.BlockSpec((1, H), lambda i: (0, 0)),
            pl.BlockSpec((H, K), lambda i: (0, 0)),
            pl.BlockSpec((1, K), lambda i: (0, 0)),
        ],
        out_specs=pl.BlockSpec((TB, K), lambda i: (i, 0)),
        compiler_params=pltpu.CompilerParams(
            dimension_semantics=("parallel",),   # megacore sharding on v7x; harmless elsewhere
        ),
    )(x_in, w1, b1, w2, b2)

    return out if Bp == B else out[:B]


def init_params(key):
    """Deterministic init mimicking nn.Linear default (uniform +/- 1/sqrt(fan_in))."""
    k1, k2, k3, k4 = jax.random.split(key, 4)
    bound1 = 1.0 / jnp.sqrt(D)
    bound2 = 1.0 / jnp.sqrt(H)
    # Stored as (in, out) = transpose of PyTorch's (out, in) weight layout.
    w1 = jax.random.uniform(k1, (D, H), jnp.float32, -bound1, bound1)
    b1 = jax.random.uniform(k2, (H,), jnp.float32, -bound1, bound1)
    w2 = jax.random.uniform(k3, (H, K), jnp.float32, -bound2, bound2)
    b2 = jax.random.uniform(k4, (K,), jnp.float32, -bound2, bound2)
    return w1, b1, w2, b2


def reference_forward(x, w1, b1, w2, b2):
    h = jnp.maximum(x @ w1 + b1, 0.0)
    return h @ w2 + b2


if __name__ == "__main__":
    key = jax.random.PRNGKey(0)
    kx, kx2, kp = jax.random.split(key, 3)

    # One-time parameter prep, hoisted out of the per-call hot path.
    params = prepare_params(*init_params(kp))

    # Small demo batch (matches the module's tiny-feature shapes).
    B_small = 8
    x_small = jax.random.normal(kx, (B_small, D), jnp.float32)
    out_small = jax.block_until_ready(simple_net_forward(x_small, *params))
    ref_small = reference_forward(x_small, *params)
    assert out_small.shape == (B_small, K)
    assert jnp.allclose(out_small, ref_small, atol=1e-5, rtol=1e-5)

    # Larger, non-multiple-of-tile batch exercising the multi-step grid + batch padding.
    B_big = 1000
    x_big = jax.random.normal(kx2, (B_big, D), jnp.float32)
    out_big = jax.block_until_ready(simple_net_forward(x_big, *params))
    ref_big = reference_forward(x_big, *params)
    assert out_big.shape == (B_big, K)
    assert jnp.allclose(out_big, ref_big, atol=1e-5, rtol=1e-5)

    print("KERNEL_OK")
</pallas_src>

<mosaic_0001>
module attributes {stable_mosaic.version = 11 : i64} {
  func.func @_mlp_kernel(%arg0: i32, %arg1: memref<8x5xf32, #tpu.memory_space<vmem>>, %arg2: memref<5x64xf32, #tpu.memory_space<vmem>>, %arg3: memref<1x64xf32, #tpu.memory_space<vmem>>, %arg4: memref<64x3xf32, #tpu.memory_space<vmem>>, %arg5: memref<1x3xf32, #tpu.memory_space<vmem>>, %arg6: memref<8x3xf32, #tpu.memory_space<vmem>>) attributes {dimension_semantics = [#tpu.dimension_semantics<parallel>], iteration_bounds = array<i64: 1>, scalar_prefetch = 0 : i64, scratch_operands = 0 : i64, tpu.core_type = #tpu.core_type<tc>, window_params = [{transform_indices = @transform_0, window_bounds = array<i64: 8, 5>}, {pipeline_mode = #tpu.pipeline_mode<synchronous>, transform_indices = @transform_1, window_bounds = array<i64: 5, 64>}, {pipeline_mode = #tpu.pipeline_mode<synchronous>, transform_indices = @transform_2, window_bounds = array<i64: 1, 64>}, {pipeline_mode = #tpu.pipeline_mode<synchronous>, transform_indices = @transform_3, window_bounds = array<i64: 64, 3>}, {pipeline_mode = #tpu.pipeline_mode<synchronous>, transform_indices = @transform_4, window_bounds = array<i64: 1, 3>}, {transform_indices = @transform_5, window_bounds = array<i64: 8, 3>}]} {
    %c0 = arith.constant 0 : index
    %c0_0 = arith.constant 0 : index
    %0 = vector.load %arg1[%c0, %c0_0] : memref<8x5xf32, #tpu.memory_space<vmem>>, vector<8x5xf32>
    %c0_1 = arith.constant 0 : index
    %c0_2 = arith.constant 0 : index
    %1 = vector.load %arg2[%c0_1, %c0_2] : memref<5x64xf32, #tpu.memory_space<vmem>>, vector<5x64xf32>
    %cst = arith.constant dense<0.000000e+00> : vector<8x64xf32>
    %2 = tpu.matmul %0, %1, %cst {dimension_numbers = #tpu.dot_dimension_numbers<[1], [0], [0], [1], [0, 0, 1, 1], [], []>} : vector<8x5xf32>, vector<5x64xf32>, vector<8x64xf32> -> vector<8x64xf32>
    %c0_3 = arith.constant 0 : index
    %c0_4 = arith.constant 0 : index
    %3 = vector.load %arg3[%c0_3, %c0_4] : memref<1x64xf32, #tpu.memory_space<vmem>>, vector<1x64xf32>
    %4 = vector.broadcast %3 : vector<1x64xf32> to vector<8x64xf32>
    %5 = arith.addf %2, %4 : vector<8x64xf32>
    %cst_5 = arith.constant 0.000000e+00 : f32
    %6 = vector.broadcast %cst_5 : f32 to vector<8x64xf32>
    %7 = arith.maximumf %5, %6 : vector<8x64xf32>
    %c0_6 = arith.constant 0 : index
    %c0_7 = arith.constant 0 : index
    %8 = vector.load %arg4[%c0_6, %c0_7] : memref<64x3xf32, #tpu.memory_space<vmem>>, vector<64x3xf32>
    %cst_8 = arith.constant dense<0.000000e+00> : vector<8x3xf32>
    %9 = tpu.matmul %7, %8, %cst_8 {dimension_numbers = #tpu.dot_dimension_numbers<[1], [0], [0], [1], [0, 0, 1, 1], [], []>} : vector<8x64xf32>, vector<64x3xf32>, vector<8x3xf32> -> vector<8x3xf32>
    %c0_9 = arith.constant 0 : index
    %c0_10 = arith.constant 0 : index
    %10 = vector.load %arg5[%c0_9, %c0_10] : memref<1x3xf32, #tpu.memory_space<vmem>>, vector<1x3xf32>
    %11 = vector.broadcast %10 : vector<1x3xf32> to vector<8x3xf32>
    %12 = arith.addf %9, %11 : vector<8x3xf32>
    %c0_11 = arith.constant 0 : index
    %c0_12 = arith.constant 0 : index
    %13 = vector.load %arg6[%c0_11, %c0_12] : memref<8x3xf32, #tpu.memory_space<vmem>>, vector<8x3xf32>
    tpu.vector_store %arg6[%c0_11, %c0_12], %12 {strides = array<i32>} : memref<8x3xf32, #tpu.memory_space<vmem>>, vector<8x3xf32>,
    return
  }
  func.func @transform_0(%arg0: i32) -> (i32, i32) {
    %c0_i32 = arith.constant 0 : i32
    %c0_i32_0 = arith.constant 0 : i32
    return %arg0, %c0_i32 : i32, i32
  }
  func.func @transform_1(%arg0: i32) -> (i32, i32) {
    %c0_i32 = arith.constant 0 : i32
    %c0_i32_0 = arith.constant 0 : i32
    %c0_i32_1 = arith.constant 0 : i32
    return %c0_i32, %c0_i32_0 : i32, i32
  }
  func.func @transform_2(%arg0: i32) -> (i32, i32) {
    %c0_i32 = arith.constant 0 : i32
    %c0_i32_0 = arith.constant 0 : i32
    %c0_i32_1 = arith.constant 0 : i32
    return %c0_i32, %c0_i32_0 : i32, i32
  }
  func.func @transform_3(%arg0: i32) -> (i32, i32) {
    %c0_i32 = arith.constant 0 : i32
    %c0_i32_0 = arith.constant 0 : i32
    %c0_i32_1 = arith.constant 0 : i32
    return %c0_i32, %c0_i32_0 : i32, i32
  }
  func.func @transform_4(%arg0: i32) -> (i32, i32) {
    %c0_i32 = arith.constant 0 : i32
    %c0_i32_0 = arith.constant 0 : i32
    %c0_i32_1 = arith.constant 0 : i32
    return %c0_i32, %c0_i32_0 : i32, i32
  }
  func.func @transform_5(%arg0: i32) -> (i32, i32) {
    %c0_i32 = arith.constant 0 : i32
    %c0_i32_0 = arith.constant 0 : i32
    return %arg0, %c0_i32 : i32, i32
  }
}

</mosaic_0001>

<bundles_post_ra>
// kernel: tpu_custom_call.1
= control target key start
LH: loop header
LB: loop body
LE: loop exit
PB: predicated region body
PF: predicated region fallthrough
CT: control target
= control target key end

     0   :  { %vm33_vm0 = vcmask 1044480   ;;  %vm29_vm1 = vcmask 39936   ;;  %v258_v0 = vmov 0.0   ;;  %vm259_vm2 = vmmov 0   ;;  %s330_s1 = inlined_call_operand.vmem [shape: f32[5,64], index: 1, kind: input, shape index: {}]   ;;  %s331_s0 = inlined_call_operand.vmem [shape: f32[8,5], index: 0, kind: input, shape index: {}]   ;;  %s332_s3 = inlined_call_operand.vmem [shape: f32[64,3], index: 3, kind: input, shape index: {}]   ;;  %s333_s2 = inlined_call_operand.vmem [shape: f32[1,64], index: 2, kind: input, shape index: {}]   ;;  %s334_s4 = inlined_call_operand.vmem [shape: f32[1,3], index: 4, kind: input, shape index: {}]   ;;  %s335_s5 = inlined_call_operand.vmem [shape: f32[8,3], index: 5, kind: output, shape index: {}]  }
   0x1   :  { %219 = vmatprep.subr.mxu0 %v258_v0  ;;  %v21_v1 = vld [vmem:[%s330_s1] sm:$0x1f]  ;;  %221 = vmatprep.mubr.msk.f32.mxu0 %vm259_vm2, %v258_v0  ;;  %v260_v4 = vmov 0.0|0.0   ;;  %v109_v5 = vld [vmem:[%s332_s3 + $0x8] sm:$0xff]  ;;  %v110_v6 = vld [vmem:[%s332_s3 + $0x10] sm:$0xff]  ;;  %vm123_vm3 = vcmask 523264  }
   0x2   :  { %v20_v2 = vld [vmem:[%s331_s0] sm:$0xff]  ;;  %220 = vmatpush3.msk.msra.mxu0 %vm33_vm0, %v21_v1  ;;  %243 = vmatprep.subr.bf16.mxu1 %v260_v4  ;;  %v111_v7 = vld [vmem:[%s332_s3 + $0x18] sm:$0xff]  ;;  %v113_v11 = vld [vmem:[%s332_s3 + $0x28] sm:$0xff]  ;;  %vm197_vm4 = vcmask 23552  }
   0x3   :  { %v108_v3 = vld [vmem:[%s332_s3] sm:$0xff]  ;;  %222 = vmatmul.mubr.msk.f32.vlgmr.msra.gmra.mrb[0].mxu0 %vm29_vm1, %v20_v2  ;;  %240 = vmatprep.mubr.msk.f32.mxu1 %vm259_vm2, %v258_v0  ;;  %v247_v9 = vpack.c.bf16 %v111_v7, %v110_v6  ;;  %v114_v13 = vld [vmem:[%s332_s3 + $0x30] sm:$0xff]  ;;  %v115_v14 = vld [vmem:[%s332_s3 + $0x38] sm:$0xff] }
   0x4   :  { %v244_v8 = vpack.c.bf16 %v109_v5, %v108_v3  ;;  %v112_v10 = vld [vmem:[%s332_s3 + $0x20] sm:$0xff]  ;;  %v253_v15 = vpack.c.bf16 %v115_v14, %v114_v13 }
   0x5   :  { %v250_v12 = vpack.c.bf16 %v113_v11, %v112_v10  ;;  %v203_v16 = vld [vmem:[%s333_s2] ss:$0 sm:$0xff] }
   0x6   :  { %245 = vmatpush3.bf16.msra.mxu1 %v244_v8  ;;  %v206_v21 = vld [vmem:[%s334_s4] ss:$0 sm:$0xff] }
   0x7   :  { %246 = vmatprep.subr.bf16.mxu1 %v260_v4 }
   0xa   :  { %248 = vmatpush3.bf16.msra.mxu1 %v247_v9 }
   0xb   :  { %249 = vmatprep.subr.bf16.mxu1 %v260_v4 }
   0xe   :  { %251 = vmatpush3.bf16.msra.mxu1 %v250_v12 }
   0xf   :  { %252 = vmatprep.subr.bf16.mxu1 %v260_v4 }
  0x12   :  { %254 = vmatpush3.bf16.msra.mxu1 %v253_v15 }
  0xd6   :  { %v103_v17 = vpop.f32.mrb[0].mxu0 }
  0xd7   :  { %v104_v18 = vadd.f32 %v203_v16, %v103_v17  ;;  %v223_v19 = vpop.f32.mrb[1].mxu0 }
  0xd9   :  { %v107_v20 = vmax.f32 %v104_v18, 0.0 }
  0xdb   :  { %241 = vmatmul.mubr.msk.f32.vlgmr.msra.gmra.mrb[0].mxu1 %vm123_vm3, %v107_v20 }
 0x1ae   :  { %v193_v22 = vpop.f32.mrb[0].mxu1 }
 0x1af   :  { %v194_v23 = vadd.f32 %v206_v21, %v193_v22  ;;  %v242_v24 = vpop.f32.mrb[1].mxu1 }
 0x1b1   :  { %198 = vst.msk [vmem:[%s335_s5] sm:$0xff] %vm197_vm4, %v194_v23 }

</bundles_post_ra>
